<compile_context>
chip_gen: v6e
topology: v6e:2x2x1
jax: 0.10.0
libtpu: 0.0.40
codegen_flags: <defaults>
</compile_context>

<pallas_src>
import jax
import jax.numpy as jnp
from jax.experimental import pallas as pl
from jax.experimental.pallas import tpu as pltpu

EPS = 1e-6


def _encoder_norm_kernel(x_ref, alpha_ref, bias_ref, o_ref):
    # x_ref: (ROW_BLK, D) tile in VMEM; alpha_ref / bias_ref: (1, D) resident.
    x = x_ref[...].astype(jnp.float32)
    d = x.shape[-1]
    inv_d = jnp.float32(1.0 / d)
    inv_dm1 = jnp.float32(1.0 / max(d - 1, 1))  # guard d_model == 1

    # One-pass statistics: both reductions issue straight off the load.
    s1 = jnp.sum(x, axis=-1, keepdims=True)
    s2 = jnp.sum(x * x, axis=-1, keepdims=True)
    mean = s1 * inv_d
    # unbiased variance, matching torch.std default (divide by N-1)
    var = (s2 - mean * s1) * inv_dm1
    var = jnp.maximum(var, jnp.float32(0.0))  # guard tiny negative (cancellation)
    std = jnp.sqrt(var)

    # Exact per-row reciprocal on the (ROW_BLK, 1) column; the full-tile op is
    # then a multiply instead of a divide.
    inv = pl.reciprocal(std + jnp.float32(EPS), approx=False)

    alpha = alpha_ref[...].astype(jnp.float32)
    bias = bias_ref[...].astype(jnp.float32)
    o_ref[...] = (alpha * ((x - mean) * inv) + bias).astype(o_ref.dtype)


def _plan_tiling(rows, d, in_itemsize, out_itemsize,
                 target_tile_bytes=4 * 1024 * 1024):
    """Pick (row_block, vmem_limit_bytes), generation-aware.

    Tile is sized by bytes (target ~4 MiB of input DMA per tile) and the whole
    pipeline footprint (double-buffered in/out + f32 intermediates at
    4 B/elem) is kept under ~50% of the physical VMEM of the current chip.
    """
    try:
        vmem_cap = int(pltpu.get_tpu_info().vmem_capacity_bytes)
    except Exception:  # not on TPU / API drift -> most conservative (v7x per-TC)
        vmem_cap = 64 * 1024 * 1024

    sublane = {4: 8, 2: 16, 1: 32}.get(in_itemsize, 8)

    # Per-row footprint of the full pipeline:
    #   2x input double buffer + 2x output double buffer
    #   + ~3 f32-sized intermediates (x_f32, x*x, output temp), budgeted at
    #     4 bytes/elem regardless of the input dtype.
    footprint_per_row = (2 * d * in_itemsize
                         + 2 * d * out_itemsize
                         + 3 * d * 4)

    vmem_budget = vmem_cap // 2
    max_rows_by_vmem = max(
        sublane, (vmem_budget // footprint_per_row) // sublane * sublane)

    # Rows that give ~target_tile_bytes of input per tile (amortizes the
    # ~0.35 us per-grid-step overhead at the HBM roofline).
    target_rows = max(
        sublane, (target_tile_bytes // max(1, d * in_itemsize))
        // sublane * sublane)

    blk = min(max_rows_by_vmem, target_rows)
    # Never bigger than the (sublane-padded) problem itself.
    blk = min(blk, pl.cdiv(rows, sublane) * sublane)
    blk = max(sublane, (blk // sublane) * sublane)

    # Explicit scoped-VMEM limit: pipeline footprint + slack, clamped to a
    # safe fraction of the physical capacity; never below the 32 MiB class.
    needed = blk * footprint_per_row + (8 << 20)
    vmem_limit = max(32 << 20, min(needed, (vmem_cap * 3) // 4))
    return int(blk), int(vmem_limit)


def encoder_forward(x, alpha, bias, mask=None, *, row_block=None):
    """Encoder forward: (no layers) -> LayerNormalization, as a Pallas kernel.

    x:     (batch, seq, d_model)
    alpha: (d_model,)
    bias:  (d_model,)
    mask:  unused (would be consumed by the injected layers)
    """
    del mask
    b, s, d = x.shape
    rows = b * s
    in_itemsize = jnp.dtype(x.dtype).itemsize

    if row_block is None:
        row_block, vmem_limit = _plan_tiling(rows, d, in_itemsize, in_itemsize)
    else:
        _, vmem_limit = _plan_tiling(rows, d, in_itemsize, in_itemsize)

    # Collapsing leading dims is a free (bitcast) reshape; no HBM pass.
    x2 = x.reshape(rows, d)
    alpha2 = alpha.reshape(1, d)
    bias2 = bias.reshape(1, d)

    # No wrapper-side padding: grid covers the unpadded rows and Pallas
    # handles the partial last block (rows are independent; OOB rows are
    # never written back to HBM).
    # TODO(synk): if d_model is not a multiple of 128, a lane-dense output
    # pad could speed up the store path further; skipped to avoid extra HBM
    # passes.
    grid = (pl.cdiv(rows, row_block),)

    out2 = pl.pallas_call(
        _encoder_norm_kernel,
        out_shape=jax.ShapeDtypeStruct((rows, d), x.dtype),
        grid_spec=pltpu.PrefetchScalarGridSpec(
            num_scalar_prefetch=0,
            grid=grid,
            in_specs=[
                pl.BlockSpec((row_block, d), lambda i: (i, 0)),
                pl.BlockSpec((1, d), lambda i: (0, 0)),  # VMEM-resident
                pl.BlockSpec((1, d), lambda i: (0, 0)),  # VMEM-resident
            ],
            out_specs=pl.BlockSpec((row_block, d), lambda i: (i, 0)),
        ),
        compiler_params=pltpu.CompilerParams(
            dimension_semantics=("parallel",),
            vmem_limit_bytes=vmem_limit,
        ),
    )(x2, alpha2, bias2)

    return out2.reshape(b, s, d)


def _reference(x, alpha, bias):
    xf = x.astype(jnp.float32)
    mean = jnp.mean(xf, axis=-1, keepdims=True)
    std = jnp.std(xf, axis=-1, keepdims=True, ddof=1)  # unbiased, like torch
    return (alpha.astype(jnp.float32) * (xf - mean) / (std + EPS)
            + bias.astype(jnp.float32)).astype(x.dtype)


if __name__ == "__main__":
    key = jax.random.PRNGKey(0)
    k1, k2, k3 = jax.random.split(key, 3)

    d_model = 128
    alpha = jnp.ones((d_model,), dtype=jnp.float32)
    bias = jnp.zeros((d_model,), dtype=jnp.float32)

    # Case 1: small, evenly tiled.
    batch, seq = 2, 8
    x = jax.random.normal(k1, (batch, seq, d_model), dtype=jnp.float32)
    mask = jnp.ones((batch, 1, seq, seq), dtype=jnp.float32)  # unused (no layers)
    out = jax.block_until_ready(encoder_forward(x, alpha, bias, mask))
    ref = _reference(x, alpha, bias)
    assert out.shape == (batch, seq, d_model)
    assert jnp.allclose(out, ref, atol=1e-5, rtol=1e-5), "mismatch (case 1)"

    # Case 2: rows not a multiple of the block -> exercises the partial-block
    # path (no wrapper pad / slice).
    batch2, seq2 = 3, 7
    x2 = jax.random.normal(k2, (batch2, seq2, d_model), dtype=jnp.float32)
    out2 = jax.block_until_ready(encoder_forward(x2, alpha, bias))
    ref2 = _reference(x2, alpha, bias)
    assert out2.shape == (batch2, seq2, d_model)
    assert jnp.allclose(out2, ref2, atol=1e-5, rtol=1e-5), "mismatch (case 2)"

    # Case 3: bf16 input path (f32 accumulation in-kernel, bf16 out).
    x3 = jax.random.normal(k3, (2, 5, d_model), dtype=jnp.float32).astype(jnp.bfloat16)
    out3 = jax.block_until_ready(encoder_forward(x3, alpha, bias))
    ref3 = _reference(x3, alpha, bias)
    assert out3.shape == (2, 5, d_model)
    assert jnp.allclose(out3.astype(jnp.float32), ref3.astype(jnp.float32),
                        atol=6e-2, rtol=6e-2), "mismatch (case 3, bf16)"

    print("KERNEL_OK")
</pallas_src>

<mosaic_0001>
module attributes {stable_mosaic.version = 11 : i64} {
  func.func @_encoder_norm_kernel(%arg0: i32, %arg1: memref<16x128xf32, #tpu.memory_space<vmem>>, %arg2: memref<1x128xf32, #tpu.memory_space<vmem>>, %arg3: memref<1x128xf32, #tpu.memory_space<vmem>>, %arg4: memref<16x128xf32, #tpu.memory_space<vmem>>) attributes {dimension_semantics = [#tpu.dimension_semantics<parallel>], iteration_bounds = array<i64: 1>, scalar_prefetch = 0 : i64, scratch_operands = 0 : i64, tpu.core_type = #tpu.core_type<tc>, window_params = [{transform_indices = @transform_0, window_bounds = array<i64: 16, 128>}, {pipeline_mode = #tpu.pipeline_mode<synchronous>, transform_indices = @transform_1, window_bounds = array<i64: 1, 128>}, {pipeline_mode = #tpu.pipeline_mode<synchronous>, transform_indices = @transform_2, window_bounds = array<i64: 1, 128>}, {transform_indices = @transform_3, window_bounds = array<i64: 16, 128>}]} {
    %c0 = arith.constant 0 : index
    %c0_0 = arith.constant 0 : index
    %0 = vector.load %arg1[%c0, %c0_0] : memref<16x128xf32, #tpu.memory_space<vmem>>, vector<16x128xf32>
    %cst = arith.constant dense<0.000000e+00> : vector<16xf32>
    %1 = vector.multi_reduction <add>, %0, %cst [1] : vector<16x128xf32> to vector<16xf32>
    %2 = vector.shape_cast %1 : vector<16xf32> to vector<16x1xf32>
    %3 = arith.mulf %0, %0 : vector<16x128xf32>
    %cst_1 = arith.constant dense<0.000000e+00> : vector<16xf32>
    %4 = vector.multi_reduction <add>, %3, %cst_1 [1] : vector<16x128xf32> to vector<16xf32>
    %5 = vector.shape_cast %4 : vector<16xf32> to vector<16x1xf32>
    %cst_2 = arith.constant 7.812500e-03 : f32
    %6 = vector.broadcast %cst_2 : f32 to vector<16x1xf32>
    %7 = arith.mulf %2, %6 : vector<16x1xf32>
    %8 = arith.mulf %7, %2 : vector<16x1xf32>
    %9 = arith.subf %5, %8 : vector<16x1xf32>
    %cst_3 = arith.constant 0.00787401571 : f32
    %10 = vector.broadcast %cst_3 : f32 to vector<16x1xf32>
    %11 = arith.mulf %9, %10 : vector<16x1xf32>
    %cst_4 = arith.constant 0.000000e+00 : f32
    %12 = vector.broadcast %cst_4 : f32 to vector<16x1xf32>
    %13 = arith.maximumf %11, %12 : vector<16x1xf32>
    %14 = math.sqrt %13 : vector<16x1xf32>
    %cst_5 = arith.constant 9.99999997E-7 : f32
    %15 = vector.broadcast %cst_5 : f32 to vector<16x1xf32>
    %16 = arith.addf %14, %15 : vector<16x1xf32>
    %17 = tpu.reciprocal %16 : vector<16x1xf32> -> vector<16x1xf32>
    %c0_6 = arith.constant 0 : index
    %c0_7 = arith.constant 0 : index
    %18 = vector.load %arg2[%c0_6, %c0_7] : memref<1x128xf32, #tpu.memory_space<vmem>>, vector<1x128xf32>
    %c0_8 = arith.constant 0 : index
    %c0_9 = arith.constant 0 : index
    %19 = vector.load %arg3[%c0_8, %c0_9] : memref<1x128xf32, #tpu.memory_space<vmem>>, vector<1x128xf32>
    %20 = vector.broadcast %7 : vector<16x1xf32> to vector<16x128xf32>
    %21 = arith.subf %0, %20 : vector<16x128xf32>
    %22 = vector.broadcast %17 : vector<16x1xf32> to vector<16x128xf32>
    %23 = arith.mulf %21, %22 : vector<16x128xf32>
    %24 = vector.broadcast %18 : vector<1x128xf32> to vector<16x128xf32>
    %25 = arith.mulf %24, %23 : vector<16x128xf32>
    %26 = vector.broadcast %19 : vector<1x128xf32> to vector<16x128xf32>
    %27 = arith.addf %25, %26 : vector<16x128xf32>
    %c0_10 = arith.constant 0 : index
    %c0_11 = arith.constant 0 : index
    %28 = vector.load %arg4[%c0_10, %c0_11] : memref<16x128xf32, #tpu.memory_space<vmem>>, vector<16x128xf32>
    tpu.vector_store %arg4[%c0_10, %c0_11], %27 {strides = array<i32>} : memref<16x128xf32, #tpu.memory_space<vmem>>, vector<16x128xf32>,
    return
  }
  func.func @transform_0(%arg0: i32) -> (i32, i32) {
    %c0_i32 = arith.constant 0 : i32
    %c0_i32_0 = arith.constant 0 : i32
    return %arg0, %c0_i32 : i32, i32
  }
  func.func @transform_1(%arg0: i32) -> (i32, i32) {
    %c0_i32 = arith.constant 0 : i32
    %c0_i32_0 = arith.constant 0 : i32
    %c0_i32_1 = arith.constant 0 : i32
    return %c0_i32, %c0_i32_0 : i32, i32
  }
  func.func @transform_2(%arg0: i32) -> (i32, i32) {
    %c0_i32 = arith.constant 0 : i32
    %c0_i32_0 = arith.constant 0 : i32
    %c0_i32_1 = arith.constant 0 : i32
    return %c0_i32, %c0_i32_0 : i32, i32
  }
  func.func @transform_3(%arg0: i32) -> (i32, i32) {
    %c0_i32 = arith.constant 0 : i32
    %c0_i32_0 = arith.constant 0 : i32
    return %arg0, %c0_i32 : i32, i32
  }
}

</mosaic_0001>

<bundles_post_ra>
// kernel: tpu_custom_call.1
= control target key start
LH: loop header
LB: loop body
LE: loop exit
PB: predicated region body
PF: predicated region fallthrough
CT: control target
= control target key end

     0   :  { %8 = vsyncpa [#allocation3], 0  ;;  %s210_s0 = inlined_call_operand.hbm [shape: f32[16,128], index: 0, kind: input, shape index: {}]   ;;  %s211_s1 = inlined_call_operand.vmem [shape: f32[1,128], index: 1, kind: input, shape index: {}]   ;;  %s212_s2 = inlined_call_operand.vmem [shape: f32[1,128], index: 2, kind: input, shape index: {}]   ;;  %s213_s3 = inlined_call_operand.hbm [shape: f32[16,128], index: 3, kind: output, shape index: {}]  }
   0x1   :  { %9 = vsyncpa [#allocation4], 0  ;;  %s168_s12 = smov [#allocation2]  }
   0x2   :  { %s15_s13 = sshll.u32 %s168_s12, 4  ;;  %s16_s13 = int_to_ptr.vmem [resolvable:$true] %s15_s13 }
   0x3   :  { %s132_s14 = scalar_lea.vmem %s16_s13, 256  ;;  %p137_p1 = scmp.lt.s32.totalorder %s16_s13, %s16_s13 }
   0x4   :  { %p133_p0 = scmp.ne.s32.totalorder %s16_s13, %s132_s14  ;;  %p138_p2 = scmp.lt.s32.totalorder %s132_s14, %s132_s14 }
   0x6   :  { %p139_p3 = por %p138_p2, %p137_p1 }
   0x8   :  { %p140_p4 = pnand %p139_p3, %p133_p0 }
   0xa   :  { %143 = shalt.err (!%p140_p4)
}
   0xb   :  { %s169_s15 = smov 128   ;;  %s170_s16 = smov 8  }
   0xc   :  { %21 = dma.hbm_to_vmem [thread:$0]  %s210_s0, 256, %s16_s13, [#allocation3], %s169_s15, %s169_s15, %s170_s16  }
   0xd   :  { %164 = dma.done.wait [#allocation3], 256  }
   0xe   :  { %165 = vsyncadd [#allocation3], 4294967040  ;;  %v29_v0 = vld [vmem:[#allocation2] sm:$0xff]  ;;  %v30_v2 = vld [vmem:[#allocation2 + $0x8] sm:$0xff]  ;;  %s171_s22 = smov [#allocation5]  }
   0xf   :  { %31 = vadd.xlane.f32.xlu0 %v29_v0  ;;  %v35_v1 = vmul.f32 %v29_v0, %v29_v0  ;;  %v36_v3 = vmul.f32 %v30_v2, %v30_v2  ;;  %v110_v32 = vld [vmem:[%s211_s1] ss:$0 sm:$0xff]  ;;  %s98_s23 = sshll.u32 %s171_s22, 4  ;;  %s99_s23 = int_to_ptr.vmem [resolvable:$true] %s98_s23 }
  0x10   :  { %v111_v34 = vld [vmem:[%s212_s2] ss:$0 sm:$0xff]  ;;  %s144_s24 = scalar_lea.vmem %s99_s23, 256  ;;  %p149_p6 = scmp.lt.s32.totalorder %s99_s23, %s99_s23 }
  0x11   :  { %37 = vadd.xlane.f32.xlu1 %v35_v1  ;;  %p145_p5 = scmp.ne.s32.totalorder %s99_s23, %s144_s24  ;;  %p150_p7 = scmp.lt.s32.totalorder %s144_s24, %s144_s24 }
  0x13   :  { %33 = vadd.xlane.f32.xlu0 %v30_v2  ;;  %p151_p8 = por %p150_p7, %p149_p6 }
  0x15   :  { %39 = vadd.xlane.f32.xlu1 %v36_v3  ;;  %p152_p9 = pnand %p151_p8, %p145_p5 }
  0x98   :  { %v32_v4 = vpop.xlane.xlu0 %31 }
  0x99   :  { %v41_v5 = vmul.f32 0.0078125, %v32_v4 }
  0x9a   :  { %v38_v6 = vpop.xlane.xlu1 %37 }
  0x9b   :  { %v43_v7 = vmul.f32 %v41_v5, %v32_v4  ;;  %v71_v30 = vsub.f32 %v29_v0, %v41_v5 }
  0x9c   :  { %v34_v8 = vpop.xlane.xlu0 %33 }
  0x9d   :  { %v42_v9 = vmul.f32 0.0078125, %v34_v8  ;;  %v45_v10 = vsub.f32 %v38_v6, %v43_v7 }
  0x9e   :  { %v40_v11 = vpop.xlane.xlu1 %39 }
  0x9f   :  { %v44_v12 = vmul.f32 %v42_v9, %v34_v8  ;;  %v47_v13 = vmul.f32 0.007874016, %v45_v10  ;;  %v72_v36 = vsub.f32 %v30_v2, %v42_v9 }
  0xa1   :  { %v49_v14 = vmax.f32 %v47_v13, 0.0  ;;  %v46_v15 = vsub.f32 %v40_v11, %v44_v12 }
  0xa3   :  { %116 = vrsqrt.f32 %v49_v14  ;;  %v48_v16 = vmul.f32 0.007874016, %v46_v15  ;;  %vm53_vm0 = vcmp.eq.f32.partialorder %v49_v14, inf  ;;  %v56_v20 = vand.u32 2147483648, %v49_v14 }
  0xa4   :  { %vm55_vm1 = vcmp.eq.f32.partialorder %v49_v14, 0.0 }
  0xa5   :  { %v50_v17 = vmax.f32 %v48_v16, 0.0 }
  0xa7   :  { %118 = vrsqrt.f32 %v50_v17  ;;  %vm60_vm2 = vcmp.eq.f32.partialorder %v50_v17, inf  ;;  %v63_v26 = vand.u32 2147483648, %v50_v17  ;;  %vm62_vm3 = vcmp.eq.f32.partialorder %v50_v17, 0.0 }
  0xb0   :  { %v117_v18 = vpop.eup %116 }
  0xb1   :  { %v52_v19 = vmul.f32 %v117_v18, %v49_v14 }
  0xb3   :  { %v54_v21 = vsel %vm53_vm0, %v49_v14, %v52_v19 }
  0xb4   :  { %v57_v22 = vsel %vm55_vm1, %v56_v20, %v54_v21  ;;  %v119_v23 = vpop.eup %118 }
  0xb5   :  { %v65_v24 = vadd.f32 1e-06, %v57_v22  ;;  %v59_v25 = vmul.f32 %v119_v23, %v50_v17 }
  0xb7   :  { %120 = vrcp.f32 %v65_v24  ;;  %v61_v27 = vsel %vm60_vm2, %v50_v17, %v59_v25 }
  0xb8   :  { %v64_v28 = vsel %vm62_vm3, %v63_v26, %v61_v27 }
  0xb9   :  { %v66_v29 = vadd.f32 1e-06, %v64_v28 }
  0xbb   :  { %122 = vrcp.f32 %v66_v29 }
  0xc4   :  { %v121_v31 = vpop.eup %120 }
  0xc5   :  { %v73_v33 = vmul.f32 %v121_v31, %v71_v30 }
  0xc7   :  { %v81_v35 = vmul.f32 %v110_v32, %v73_v33 }
  0xc8   :  { %v123_v37 = vpop.eup %122 }
  0xc9   :  { %v89_v38 = vadd.f32 %v111_v34, %v81_v35  ;;  %v74_v39 = vmul.f32 %v123_v37, %v72_v36 }
  0xcb   :  { %91 = vst [vmem:[#allocation5] sm:$0xff] %v89_v38  ;;  %v82_v40 = vmul.f32 %v110_v32, %v74_v39 }
  0xcd   :  { %v90_v41 = vadd.f32 %v111_v34, %v82_v40 }
  0xcf   :  { %92 = vst [vmem:[#allocation5 + $0x8] sm:$0xff] %v90_v41 }
  0xd0   :  { %155 = shalt.err (!%p152_p9)
}
  0xd1   :  { %104 = dma.vmem_to_hbm [thread:$0]  %s99_s23, 256, %s213_s3, [#allocation4], %s169_s15, %s169_s15, %s170_s16  }
  0xd2   :  { %166 = dma.done.wait [#allocation4], 256  }
  0xd3   :  { %167 = vsyncadd [#allocation4], 4294967040 }
  0xd4   :  { %108 = vsyncpa [#allocation3], 1 }
  0xd5   :  { %109 = vsyncpa [#allocation4], 1 }

</bundles_post_ra>
